<compile_context>
chip_gen: v7x
topology: tpu7x:2x2x1
jax: 0.10.0
libtpu: 0.0.40
codegen_flags: <defaults>
</compile_context>

<pallas_src>
import jax
import jax.numpy as jnp
from jax.experimental import pallas as pl
from jax.experimental.pallas import tpu as pltpu

EPS = 1e-5          # nn.InstanceNorm2d default eps
NEG_SLOPE = 0.2     # LeakyReLU slope


# --------------------------------------------------------------------------------------
# Kernel
# --------------------------------------------------------------------------------------
def _make_kernel(do_act: bool, n_hw: int, hw_tile: int, hw_total: int):
    aligned = (hw_tile % 128 == 0)

    def kernel(p_ref, w_ref, o_ref, sum_ref, ssq_ref):
        # p_ref:   (1, CKK, hw_tile)   compute_dtype   patches tile (HW on lanes)
        # w_ref:   (cout_tile, CKK)    compute_dtype   flattened conv weight tile
        # o_ref:   (1, cout_tile, HW)  out dtype       resident output block (across hw)
        # sum_ref: (cout_tile, 1)      f32             running per-channel sum
        # ssq_ref: (cout_tile, 1)      f32             running per-channel sum of squares
        hw = pl.program_id(2)

        @pl.when(hw == 0)
        def _init():
            sum_ref[...] = jnp.zeros_like(sum_ref)
            ssq_ref[...] = jnp.zeros_like(ssq_ref)

        # Conv tile as an MXU matmul; f32 accumulation regardless of operand dtype.
        y = jnp.dot(w_ref[...], p_ref[0], preferred_element_type=jnp.float32)

        # Incremental f32 InstanceNorm statistics from the *un-rounded* conv output.
        sum_ref[...] += jnp.sum(y, axis=-1, keepdims=True)
        ssq_ref[...] += jnp.sum(y * y, axis=-1, keepdims=True)

        start = hw * hw_tile
        if aligned:
            start = pl.multiple_of(start, 128)
        o_ref[0, :, pl.ds(start, hw_tile)] = y.astype(o_ref.dtype)

        # Finalize at the last hw tile: mean/var from the scratch sums, then normalize
        # (+ LeakyReLU) the resident slab chunk-by-chunk — bounded vreg/VMEM pressure.
        @pl.when(hw == n_hw - 1)
        def _finalize():
            inv_n = 1.0 / float(hw_total)
            mean = sum_ref[...] * inv_n                              # (cout_tile, 1)
            var = jnp.maximum(ssq_ref[...] * inv_n - mean * mean, 0.0)
            scale = jax.lax.rsqrt(var + EPS)                         # (cout_tile, 1)
            shift = mean * scale

            def norm_chunk(t):
                s = t * hw_tile
                if aligned and not isinstance(s, int):
                    s = pl.multiple_of(s, 128)
                c = o_ref[0, :, pl.ds(s, hw_tile)].astype(jnp.float32)
                yn = c * scale - shift
                if do_act:
                    yn = jnp.where(yn > 0, yn, NEG_SLOPE * yn)
                o_ref[0, :, pl.ds(s, hw_tile)] = yn.astype(o_ref.dtype)

            if n_hw <= 8:
                for t in range(n_hw):                                # trace-time unroll
                    norm_chunk(t)
            else:
                def body(t, carry):
                    norm_chunk(t)
                    return carry
                jax.lax.fori_loop(0, n_hw, body, 0)

    return kernel


# --------------------------------------------------------------------------------------
# Tile / VMEM budgeting
# --------------------------------------------------------------------------------------
def _vmem_capacity_bytes():
    try:
        info = pltpu.get_tpu_info()
        cap = getattr(info, "vmem_capacity_bytes", None)
        if cap:
            return int(cap)
    except Exception:
        pass
    return 64 * 1024 * 1024  # conservative fallback (v7x per-TensorCore VMEM)


def _pick_tile(total, target, quantum):
    """Largest divisor of `total` that is <= target and a multiple of `quantum`;
    falls back to the full extent (always legal: block == full dim)."""
    if total <= target:
        return total
    t = (min(target, total) // quantum) * quantum
    while t >= quantum:
        if total % t == 0:
            return t
        t -= quantum
    return total


# --------------------------------------------------------------------------------------
# Wrapper
# --------------------------------------------------------------------------------------
def conv_in_relu(x, weight, ksize, padding, *, bias=None, do_act=True,
                 compute_dtype=None, out_dtype=None, hw_tile=None, cout_tile=None):
    """x: (N, Cin, H, W) NCHW; weight: (Cout, Cin, K, K).

    `bias` is accepted for API parity with nn.Conv2d(bias=True) but intentionally
    unused: with InstanceNorm2d (affine=False) right after the conv, the per-channel
    bias cancels exactly under the mean subtraction and leaves the variance unchanged.
    """
    del bias  # mathematically a no-op under InstanceNorm

    N, Cin, H, W = x.shape
    Cout = weight.shape[0]
    K, P = int(ksize), int(padding)
    Ho = H + 2 * P - K + 1
    Wo = W + 2 * P - K + 1
    HW = Ho * Wo
    CKK = Cin * K * K

    if compute_dtype is None:
        compute_dtype = jnp.bfloat16     # MXU operands; accumulation / stats stay f32
    if out_dtype is None:
        out_dtype = x.dtype

    # --- patches (im2col) ---------------------------------------------------------
    xc = x.astype(compute_dtype)
    if K == 1 and P == 0:
        # 1x1 conv: no im2col at all (zero HBM amplification).
        patches = xc.reshape(N, CKK, HW)
    else:
        # TODO(synk): form patches in-kernel from a padded input (K*K shifted-slice
        #   matmuls) to remove the K^2 im2col HBM round trip.
        patches = jax.lax.conv_general_dilated_patches(
            xc, filter_shape=(K, K), window_strides=(1, 1),
            padding=((P, P), (P, P)))                       # (N, CKK, Ho, Wo), compute dt
        patches = patches.reshape(N, CKK, HW)

    w_flat = weight.reshape(Cout, CKK).astype(compute_dtype)   # (Cout, CKK)

    # --- budget-driven tiling -------------------------------------------------------
    csz = jnp.dtype(compute_dtype).itemsize
    osz = jnp.dtype(out_dtype).itemsize
    cap = _vmem_capacity_bytes()
    usable = int(cap * 0.8)

    if hw_tile is None:
        in_budget = usable // 4                              # streamed patch double buffers
        t = in_budget // max(1, 2 * CKK * csz)
        t = max(128, (t // 128) * 128)
        hw_tile = _pick_tile(HW, int(min(4096, t)), 128)
    if cout_tile is None:
        out_budget = usable // 2                             # resident out slab (2 buffers)
        cmax = out_budget // max(1, 2 * HW * osz)
        q = 128 if (Cout % 128 == 0 and cmax >= 128) else 8
        c_target = int(max(q, min(512, cmax)))
        cout_tile = _pick_tile(Cout, c_target, q)

    assert HW % hw_tile == 0 and Cout % cout_tile == 0, (HW, hw_tile, Cout, cout_tile)
    n_hw = HW // hw_tile
    n_co = Cout // cout_tile

    need = (2 * CKK * hw_tile * csz          # patch double buffers
            + 2 * cout_tile * CKK * csz      # weight double buffers
            + 2 * cout_tile * HW * osz       # resident output slab (double-buffered)
            + 2 * cout_tile * 128 * 4)       # lane-padded f32 scratch
    vmem_limit = int(max(32 << 20, min(need + (8 << 20), int(cap * 0.9))))

    kernel = _make_kernel(do_act, n_hw, hw_tile, HW)

    out_flat = pl.pallas_call(
        kernel,
        out_shape=jax.ShapeDtypeStruct((N, Cout, HW), out_dtype),
        grid_spec=pltpu.PrefetchScalarGridSpec(
            num_scalar_prefetch=0,
            grid=(n_co, N, n_hw),            # cout outermost: weight fetched once per tile
            in_specs=[
                pl.BlockSpec((1, CKK, hw_tile), lambda co, n, hw: (n, 0, hw)),
                pl.BlockSpec((cout_tile, CKK), lambda co, n, hw: (co, 0)),
            ],
            # Output block ignores hw -> stays resident in VMEM across the HW axis.
            out_specs=pl.BlockSpec((1, cout_tile, HW), lambda co, n, hw: (n, co, 0)),
            scratch_shapes=[pltpu.VMEM((cout_tile, 1), jnp.float32),
                            pltpu.VMEM((cout_tile, 1), jnp.float32)],
        ),
        compiler_params=pltpu.CompilerParams(
            dimension_semantics=("parallel", "parallel", "arbitrary"),
            vmem_limit_bytes=vmem_limit),
    )(patches, w_flat)

    # (N, Cout, HW) -> NCHW with a pure reshape (no transpose).
    return out_flat.reshape(N, Cout, Ho, Wo)


# --------------------------------------------------------------------------------------
# Pure-JAX reference (matches ConvInRELU.forward, including the conv bias)
# --------------------------------------------------------------------------------------
def reference(x, weight, bias, padding, do_act=True):
    y = jax.lax.conv_general_dilated(
        x.astype(jnp.float32), weight.astype(jnp.float32),
        window_strides=(1, 1),
        padding=((padding, padding), (padding, padding)),
        dimension_numbers=("NCHW", "OIHW", "NCHW"),
    ) + bias.reshape(1, -1, 1, 1)
    mean = jnp.mean(y, axis=(2, 3), keepdims=True)
    var = jnp.mean((y - mean) ** 2, axis=(2, 3), keepdims=True)
    yn = (y - mean) * jax.lax.rsqrt(var + EPS)
    if do_act:
        yn = jnp.where(yn > 0, yn, NEG_SLOPE * yn)
    return yn


if __name__ == "__main__":
    # Small, module-consistent shapes (3x3 ConvInRELU + the 1x1 BottConvInRELU path).
    N, Cin, H, W = 2, 4, 16, 16
    Cout, K, P = 16, 3, 1

    key = jax.random.PRNGKey(0)
    kx, kw, kb, kw1, kb1 = jax.random.split(key, 5)
    x = jax.random.normal(kx, (N, Cin, H, W), dtype=jnp.float32)
    fan_in = Cin * K * K
    bound = 1.0 / (fan_in ** 0.5)
    weight = jax.random.uniform(kw, (Cout, Cin, K, K), jnp.float32, -bound, bound)
    bias = jax.random.uniform(kb, (Cout,), jnp.float32, -bound, bound)

    ref = jax.block_until_ready(reference(x, weight, bias, P, do_act=True))

    # 3x3 ConvInRELU, f32 MXU operands: exact path, tight tolerance.
    # hw_tile=128 / cout_tile=8 exercise the incremental-stats + chunked finalize path.
    out = conv_in_relu(x, weight, ksize=K, padding=P, bias=bias, do_act=True,
                       compute_dtype=jnp.float32, hw_tile=128, cout_tile=8)
    out = jax.block_until_ready(out)
    assert out.shape == (N, Cout, H, W), out.shape
    err = float(jnp.max(jnp.abs(out - ref)))
    assert jnp.allclose(out, ref, atol=5e-4, rtol=5e-4), err

    # Default path: bf16 MXU operands (f32 accumulation, f32 InstanceNorm stats),
    # auto tile / VMEM budgeting.
    out_bf = jax.block_until_ready(
        conv_in_relu(x, weight, ksize=K, padding=P, bias=bias, do_act=True))
    err_bf = float(jnp.max(jnp.abs(out_bf - ref)))
    assert jnp.allclose(out_bf, ref, atol=1e-1, rtol=1e-1), err_bf

    # 1x1 ConvInRELU (BottConvInRELU conv1/conv3): exercises the no-im2col fast path
    # and do_act=False.
    Cout1 = 8
    w1 = jax.random.uniform(kw1, (Cout1, Cout, 1, 1), jnp.float32, -0.25, 0.25)
    b1 = jax.random.uniform(kb1, (Cout1,), jnp.float32, -0.25, 0.25)
    ref1 = jax.block_until_ready(reference(out, w1, b1, 0, do_act=False))
    out1 = jax.block_until_ready(
        conv_in_relu(out, w1, ksize=1, padding=0, bias=b1, do_act=False,
                     compute_dtype=jnp.float32))
    err1 = float(jnp.max(jnp.abs(out1 - ref1)))
    assert jnp.allclose(out1, ref1, atol=5e-4, rtol=5e-4), err1

    print("KERNEL_OK")
</pallas_src>

<mosaic_0001>
module attributes {stable_mosaic.version = 11 : i64} {
  func.func @kernel(%arg0: i32, %arg1: i32, %arg2: i32, %arg3: memref<1x36x128xf32, #tpu.memory_space<vmem>>, %arg4: memref<8x36xf32, #tpu.memory_space<vmem>>, %arg5: memref<1x8x256xf32, #tpu.memory_space<vmem>>, %arg6: memref<8x1xf32, #tpu.memory_space<vmem>>, %arg7: memref<8x1xf32, #tpu.memory_space<vmem>>) attributes {dimension_semantics = [#tpu.dimension_semantics<parallel>, #tpu.dimension_semantics<parallel>, #tpu.dimension_semantics<arbitrary>], iteration_bounds = array<i64: 2, 2, 2>, scalar_prefetch = 0 : i64, scratch_operands = 2 : i64, tpu.core_type = #tpu.core_type<tc>, window_params = [{transform_indices = @transform_0, window_bounds = array<i64: 1, 36, 128>}, {transform_indices = @transform_1, window_bounds = array<i64: 8, 36>}, {transform_indices = @transform_2, window_bounds = array<i64: 1, 8, 256>}]} {
    %c0_i32 = arith.constant 0 : i32
    %0 = arith.cmpi eq, %arg2, %c0_i32 : i32
    %1 = arith.extui %0 : i1 to i32
    %c0_i32_0 = arith.constant 0 : i32
    %2 = arith.cmpi ne, %1, %c0_i32_0 : i32
    scf.if %2 {
      %cst_18 = arith.constant 0.000000e+00 : f32
      %27 = vector.broadcast %cst_18 : f32 to vector<8x1xf32>
      %c0_19 = arith.constant 0 : index
      %c0_20 = arith.constant 0 : index
      %28 = vector.load %arg6[%c0_19, %c0_20] : memref<8x1xf32, #tpu.memory_space<vmem>>, vector<8x1xf32>
      tpu.vector_store %arg6[%c0_19, %c0_20], %27 {strides = array<i32>} : memref<8x1xf32, #tpu.memory_space<vmem>>, vector<8x1xf32>,
      %cst_21 = arith.constant 0.000000e+00 : f32
      %29 = vector.broadcast %cst_21 : f32 to vector<8x1xf32>
      %c0_22 = arith.constant 0 : index
      %c0_23 = arith.constant 0 : index
      %30 = vector.load %arg7[%c0_22, %c0_23] : memref<8x1xf32, #tpu.memory_space<vmem>>, vector<8x1xf32>
      tpu.vector_store %arg7[%c0_22, %c0_23], %29 {strides = array<i32>} : memref<8x1xf32, #tpu.memory_space<vmem>>, vector<8x1xf32>,
    } else {
    }
    %c0 = arith.constant 0 : index
    %c0_1 = arith.constant 0 : index
    %3 = vector.load %arg4[%c0, %c0_1] : memref<8x36xf32, #tpu.memory_space<vmem>>, vector<8x36xf32>
    %c0_2 = arith.constant 0 : index
    %c0_3 = arith.constant 0 : index
    %c0_4 = arith.constant 0 : index
    %4 = vector.load %arg3[%c0_2, %c0_3, %c0_4] : memref<1x36x128xf32, #tpu.memory_space<vmem>>, vector<1x36x128xf32>
    %5 = vector.shape_cast %4 : vector<1x36x128xf32> to vector<36x128xf32>
    %cst = arith.constant dense<0.000000e+00> : vector<8x128xf32>
    %6 = tpu.matmul %3, %5, %cst {dimension_numbers = #tpu.dot_dimension_numbers<[1], [0], [0], [1], [0, 0, 1, 1], [], []>} : vector<8x36xf32>, vector<36x128xf32>, vector<8x128xf32> -> vector<8x128xf32>
    %c0_5 = arith.constant 0 : index
    %c0_6 = arith.constant 0 : index
    %7 = vector.load %arg6[%c0_5, %c0_6] : memref<8x1xf32, #tpu.memory_space<vmem>>, vector<8x1xf32>
    %cst_7 = arith.constant dense<0.000000e+00> : vector<8xf32>
    %8 = vector.multi_reduction <add>, %6, %cst_7 [1] : vector<8x128xf32> to vector<8xf32>
    %9 = vector.shape_cast %8 : vector<8xf32> to vector<8x1xf32>
    %10 = arith.addf %7, %9 : vector<8x1xf32>
    %c0_8 = arith.constant 0 : index
    %c0_9 = arith.constant 0 : index
    %11 = vector.load %arg6[%c0_8, %c0_9] : memref<8x1xf32, #tpu.memory_space<vmem>>, vector<8x1xf32>
    tpu.vector_store %arg6[%c0_8, %c0_9], %10 {strides = array<i32>} : memref<8x1xf32, #tpu.memory_space<vmem>>, vector<8x1xf32>,
    %c0_10 = arith.constant 0 : index
    %c0_11 = arith.constant 0 : index
    %12 = vector.load %arg7[%c0_10, %c0_11] : memref<8x1xf32, #tpu.memory_space<vmem>>, vector<8x1xf32>
    %13 = arith.mulf %6, %6 : vector<8x128xf32>
    %cst_12 = arith.constant dense<0.000000e+00> : vector<8xf32>
    %14 = vector.multi_reduction <add>, %13, %cst_12 [1] : vector<8x128xf32> to vector<8xf32>
    %15 = vector.shape_cast %14 : vector<8xf32> to vector<8x1xf32>
    %16 = arith.addf %12, %15 : vector<8x1xf32>
    %c0_13 = arith.constant 0 : index
    %c0_14 = arith.constant 0 : index
    %17 = vector.load %arg7[%c0_13, %c0_14] : memref<8x1xf32, #tpu.memory_space<vmem>>, vector<8x1xf32>
    tpu.vector_store %arg7[%c0_13, %c0_14], %16 {strides = array<i32>} : memref<8x1xf32, #tpu.memory_space<vmem>>, vector<8x1xf32>,
    %c128_i32 = arith.constant 128 : i32
    %18 = arith.muli %arg2, %c128_i32 : i32
    %19 = tpu.assume_multiple %18, 128 : i32
    %c0_15 = arith.constant 0 : index
    %c0_16 = arith.constant 0 : index
    %20 = arith.index_cast %19 : i32 to index
    %21 = vector.load %arg5[%c0_15, %c0_16, %20] : memref<1x8x256xf32, #tpu.memory_space<vmem>>, vector<1x8x128xf32>
    %22 = vector.shape_cast %21 : vector<1x8x128xf32> to vector<8x128xf32>
    %23 = vector.shape_cast %6 : vector<8x128xf32> to vector<1x8x128xf32>
    tpu.vector_store %arg5[%c0_15, %c0_16, %20], %23 {strides = array<i32>} : memref<1x8x256xf32, #tpu.memory_space<vmem>>, vector<1x8x128xf32>,
    %c1_i32 = arith.constant 1 : i32
    %24 = arith.cmpi eq, %arg2, %c1_i32 : i32
    %25 = arith.extui %24 : i1 to i32
    %c0_i32_17 = arith.constant 0 : i32
    %26 = arith.cmpi ne, %25, %c0_i32_17 : i32
    scf.if %26 {
      %c0_18 = arith.constant 0 : index
      %c0_19 = arith.constant 0 : index
      %27 = vector.load %arg6[%c0_18, %c0_19] : memref<8x1xf32, #tpu.memory_space<vmem>>, vector<8x1xf32>
      %cst_20 = arith.constant 3.906250e-03 : f32
      %28 = vector.broadcast %cst_20 : f32 to vector<8x1xf32>
      %29 = arith.mulf %27, %28 : vector<8x1xf32>
      %c0_21 = arith.constant 0 : index
      %c0_22 = arith.constant 0 : index
      %30 = vector.load %arg7[%c0_21, %c0_22] : memref<8x1xf32, #tpu.memory_space<vmem>>, vector<8x1xf32>
      %cst_23 = arith.constant 3.906250e-03 : f32
      %31 = vector.broadcast %cst_23 : f32 to vector<8x1xf32>
      %32 = arith.mulf %30, %31 : vector<8x1xf32>
      %33 = arith.mulf %29, %29 : vector<8x1xf32>
      %34 = arith.subf %32, %33 : vector<8x1xf32>
      %cst_24 = arith.constant 0.000000e+00 : f32
      %35 = vector.broadcast %cst_24 : f32 to vector<8x1xf32>
      %36 = arith.maximumf %34, %35 : vector<8x1xf32>
      %cst_25 = arith.constant 9.99999974E-6 : f32
      %37 = vector.broadcast %cst_25 : f32 to vector<8x1xf32>
      %38 = arith.addf %36, %37 : vector<8x1xf32>
      %39 = math.rsqrt %38 : vector<8x1xf32>
      %40 = arith.mulf %29, %39 : vector<8x1xf32>
      %c0_26 = arith.constant 0 : index
      %c0_27 = arith.constant 0 : index
      %c0_28 = arith.constant 0 : index
      %41 = vector.load %arg5[%c0_26, %c0_27, %c0_28] : memref<1x8x256xf32, #tpu.memory_space<vmem>>, vector<1x8x128xf32>
      %42 = vector.shape_cast %41 : vector<1x8x128xf32> to vector<8x128xf32>
      %43 = vector.broadcast %39 : vector<8x1xf32> to vector<8x128xf32>
      %44 = arith.mulf %42, %43 : vector<8x128xf32>
      %45 = vector.broadcast %40 : vector<8x1xf32> to vector<8x128xf32>
      %46 = arith.subf %44, %45 : vector<8x128xf32>
      %cst_29 = arith.constant 0.000000e+00 : f32
      %47 = vector.broadcast %cst_29 : f32 to vector<8x128xf32>
      %48 = arith.cmpf ogt, %46, %47 : vector<8x128xf32>
      %cst_30 = arith.constant 2.000000e-01 : f32
      %49 = vector.broadcast %cst_30 : f32 to vector<8x128xf32>
      %50 = arith.mulf %49, %46 : vector<8x128xf32>
      %51 = arith.select %48, %46, %50 : vector<8x128xi1>, vector<8x128xf32>
      %c0_31 = arith.constant 0 : index
      %c0_32 = arith.constant 0 : index
      %c0_33 = arith.constant 0 : index
      %52 = vector.load %arg5[%c0_31, %c0_32, %c0_33] : memref<1x8x256xf32, #tpu.memory_space<vmem>>, vector<1x8x128xf32>
      %53 = vector.shape_cast %52 : vector<1x8x128xf32> to vector<8x128xf32>
      %54 = vector.shape_cast %51 : vector<8x128xf32> to vector<1x8x128xf32>
      tpu.vector_store %arg5[%c0_31, %c0_32, %c0_33], %54 {strides = array<i32>} : memref<1x8x256xf32, #tpu.memory_space<vmem>>, vector<1x8x128xf32>,
      %c0_34 = arith.constant 0 : index
      %c0_35 = arith.constant 0 : index
      %c128 = arith.constant 128 : index
      %55 = vector.load %arg5[%c0_34, %c0_35, %c128] : memref<1x8x256xf32, #tpu.memory_space<vmem>>, vector<1x8x128xf32>
      %56 = vector.shape_cast %55 : vector<1x8x128xf32> to vector<8x128xf32>
      %57 = vector.broadcast %39 : vector<8x1xf32> to vector<8x128xf32>
      %58 = arith.mulf %56, %57 : vector<8x128xf32>
      %59 = vector.broadcast %40 : vector<8x1xf32> to vector<8x128xf32>
      %60 = arith.subf %58, %59 : vector<8x128xf32>
      %cst_36 = arith.constant 0.000000e+00 : f32
      %61 = vector.broadcast %cst_36 : f32 to vector<8x128xf32>
      %62 = arith.cmpf ogt, %60, %61 : vector<8x128xf32>
      %cst_37 = arith.constant 2.000000e-01 : f32
      %63 = vector.broadcast %cst_37 : f32 to vector<8x128xf32>
      %64 = arith.mulf %63, %60 : vector<8x128xf32>
      %65 = arith.select %62, %60, %64 : vector<8x128xi1>, vector<8x128xf32>
      %c0_38 = arith.constant 0 : index
      %c0_39 = arith.constant 0 : index
      %c128_40 = arith.constant 128 : index
      %66 = vector.load %arg5[%c0_38, %c0_39, %c128_40] : memref<1x8x256xf32, #tpu.memory_space<vmem>>, vector<1x8x128xf32>
      %67 = vector.shape_cast %66 : vector<1x8x128xf32> to vector<8x128xf32>
      %68 = vector.shape_cast %65 : vector<8x128xf32> to vector<1x8x128xf32>
      tpu.vector_store %arg5[%c0_38, %c0_39, %c128_40], %68 {strides = array<i32>} : memref<1x8x256xf32, #tpu.memory_space<vmem>>, vector<1x8x128xf32>,
    } else {
    }
    return
  }
  func.func @transform_0(%arg0: i32, %arg1: i32, %arg2: i32) -> (i32, i32, i32) {
    %c0_i32 = arith.constant 0 : i32
    %c0_i32_0 = arith.constant 0 : i32
    return %arg1, %c0_i32, %arg2 : i32, i32, i32
  }
  func.func @transform_1(%arg0: i32, %arg1: i32, %arg2: i32) -> (i32, i32) {
    %c0_i32 = arith.constant 0 : i32
    %c0_i32_0 = arith.constant 0 : i32
    return %arg0, %c0_i32 : i32, i32
  }
  func.func @transform_2(%arg0: i32, %arg1: i32, %arg2: i32) -> (i32, i32, i32) {
    %c0_i32 = arith.constant 0 : i32
    %c0_i32_0 = arith.constant 0 : i32
    return %arg1, %arg0, %c0_i32 : i32, i32, i32
  }
}

</mosaic_0001>

<bundles_post_ra>
// kernel: tpu_custom_call.1
= control target key start
LH: loop header
LB: loop body
LE: loop exit
PB: predicated region body
PF: predicated region fallthrough
CT: control target
= control target key end

     0   :  { %s1009_s0 = inlined_call_operand.vmem [shape: f32[2,36,256], index: 0, kind: input, shape index: {}]   ;;  %s1010_s1 = inlined_call_operand.vmem [shape: f32[16,36], index: 1, kind: input, shape index: {}]   ;;  %s1011_s2 = inlined_call_operand.hbm [shape: f32[2,16,256], index: 2, kind: output, shape index: {}]  }
   0x1   :  { %1013 = sst [smem:[#allocation9_spill]] %s1009_s0 }
   0x2   :  { %7 = vsyncpa [#allocation6], 0 }
   0x3   :  { %9 = vsyncpa [#allocation6 + $0x1], 0  ;;  %s807_s9 = smov 0   ;;  %s809_s10 = smov 0  }
   0x4   :  { %s811_s11 = smov 0   ;;  %s813_s12 = smov 0  }
   0x5   :  { %s815_s13 = smov 0   ;;  %s817_s14 = smov 0  }
   0x6   :  { %s819_s15 = smov 0   ;;  %s821_s16 = smov 0  }
   0x7   :  { %s823_s17 = smov 0   ;;  %s825_s18 = smov 0  }
   0x8   :  { %s827_s19 = smov 0   ;;  %s829_s20 = smov 0  }
   0x9 LB: > { %s499_s21 = sadd.s32 4294967295, %s784_s20   ;;  %s500_s22 = sadd.s32 4294967294, %s784_s20   ;;  %s784_s20 = sphi %s829_s20, %s15_s20   ;;  %s780_s19 = sphi %s827_s19, %s1030_s19   ;;  %s776_s18 = sphi %s825_s18, %s1029_s18   ;;  %s772_s17 = sphi %s823_s17, %s1028_s17   ;;  %s768_s16 = sphi %s821_s16, %s1027_s16   ;;  %s764_s15 = sphi %s819_s15, %s1026_s15   ;;  %s760_s14 = sphi %s817_s14, %s1025_s14   ;;  %s756_s13 = sphi %s815_s13, %s1024_s13   ;;  %s752_s12 = sphi %s813_s12, %s1023_s12   ;;  %s748_s11 = sphi %s811_s11, %s1022_s11   ;;  %s744_s10 = sphi %s809_s10, %s1021_s10   ;;  %s740_s9 = sphi %s807_s9, %s1020_s9  }
   0xa   : > { %s27_s23 = sadd.s32 1, %s772_s17  ;;  %s30_s24 = sadd.s32 1, %s776_s18 }
   0xb   : > { %p28_p0 = scmp.ge.s32.totalorder %s27_s23, 2  ;;  %s34_s25 = sadd.s32 1, %s780_s19 }
   0xc   : > { %s43_s26 = sadd.s32 1, %s756_s13  ;;  %p50_p1 = scmp.ne.s32.totalorder %s756_s13, %s752_s12 }
   0xd   : > { %s1032_s23 = smov (%p28_p0, %s27_s23), 0  ;;  %s1034_s24 = smov (!%p28_p0, %s30_s24), %s776_s18 }
   0xe   : > { %s39_s27 = ssub.s32 %s772_s17, %s1032_s23  ;;  %p51_p2 = scmp.eq.s32.totalorder %s784_s20, 0 }
   0xf   : > { %p32_p3 = scmp.ge.s32.totalorder %s1034_s24, 2  ;;  %s97_s28 = sadd.s32 1, %s748_s11 }
  0x10   : > { %p882_p4 = por %p51_p2, %p50_p1  ;;  %p107_p5 = scmp.ne.s32.totalorder %s748_s11, %s744_s10 }
  0x11   : > { %s1036_s24 = smov (%p32_p3, %s1034_s24), 0  ;;  %s1038_s25 = smov (!%p32_p3, %s34_s25), %s780_s19 }
  0x12   : > { %s38_s30 = ssub.s32 %s776_s18, %s1036_s24  ;;  %p108_p6 = scmp.eq.s32.totalorder %s499_s21, 7 }
  0x13   : > { %p36_p7 = scmp.ge.s32.totalorder %s1038_s25, 2  ;;  %s40_s3 = sor.u32 %s39_s27, %s38_s30 }
  0x14   : > { %p41_p8 = scmp.eq.s32.totalorder %s40_s3, 0  ;;  %p893_p9 = por %p108_p6, %p107_p5 }
  0x15   : > { %s1040_s25 = smov (%p36_p7, %s1038_s25), 0  ;;  %p113_p10 = scmp.ne.s32.totalorder %s744_s10, %s740_s9 }
  0x16   : > { %1016 = sst [smem:[#allocation8_spill]] %s1040_s25  ;;  %s93_s6 = ssub.s32 %s780_s19, %s1040_s25 }
  0x17   : > { %s900_s5 = scalar_select %p41_p8, %s756_s13, %s43_s26  }
  0x18   : > { %s94_s7 = sor.u32 %s93_s6, %s38_s30  ;;  %p114_p11 = scmp.eq.s32.totalorder %s500_s22, 7 }
  0x19   : > { %p95_p12 = scmp.eq.s32.totalorder %s94_s7, 0  ;;  %p502_p0 = scmp.ge.s32.totalorder %s784_s20, 8 }
  0x1a   : > { %p906_p13 = por %p114_p11, %p113_p10 }
  0x1b   : > { %s911_s21 = scalar_select %p95_p12, %s748_s11, %s97_s28  }
  0x1c   : > { %130 = sbr.rel (%p502_p0) target bundleno = 47 (0x2f), region = 16 }
  0x23   : > { %133 = sbr.rel (!%p882_p4) target bundleno = 47 (0x2f), region = 20  ;;  %s135_s26 = sand.u32 (%p882_p4), 1, %s756_s13  }
  0x24   : > { %s545_s27 = smul.u32 (%p882_p4), 10, %s776_s18  ;;  %s1018_s0 = sld [smem:[#allocation9_spill]] (%p882_p4) }
  0x25   : > { %s544_s30 = smul.u32 (%p882_p4), 40, %s135_s26 }
  0x26   : > { %s139_s22 = sadd.s32 (%p882_p4), %s772_s17, %s545_s27 }
  0x27   : > { %s503_s3 = sshll.u32 (%p882_p4), %s139_s22, 3  ;;  %s137_s28 = scalar_lea.vmem (%p882_p4), [#allocation4], %s544_s30 }
  0x2a   : > { %s141_s25 = scalar_lea.vmem %s1018_s0, %s503_s3 }
  0x2b   : > { %v177_v0 = vld [vmem:[%s141_s25] sm:$0xff]  ;;  %v179_v1 = vld [vmem:[%s141_s25 + $0x10] sm:$0xff] }
  0x2c   : > { %v181_v2 = vld [vmem:[%s141_s25 + $0x20] sm:$0xff]  ;;  %178 = vst [vmem:[%s137_s28] sm:$0xff] %v177_v0  ;;  %180 = vst [vmem:[%s137_s28 + $0x8] sm:$0xff] %v179_v1  ;;  %v183_v3 = vld [vmem:[%s141_s25 + $0x30] sm:$0xff] }
  0x2d   : > { %182 = vst [vmem:[%s137_s28 + $0x10] sm:$0xff] %v181_v2  ;;  %v185_v4 = vld [vmem:[%s141_s25 + $0x40] sm:$0xff]  ;;  %184 = vst [vmem:[%s137_s28 + $0x18] sm:$0xff] %v183_v3 }
  0x2e   : > { %186 = vst [vmem:[%s137_s28 + $0x20] sm:$0xff] %v185_v4 }
  0x2f PF: > { %p504_p1 = scmp.ge.s32.totalorder %s784_s20, 1  ;;  %p198_p2 = scmp.lt.s32.totalorder %s784_s20, 9 }
  0x31   : > { %p199_p3 = pnand %p504_p1, %p198_p2 }
  0x32   : > { %s205_s29 = sand.u32 (!%p199_p3), 1, %s752_s12   ;;  %s227_s26 = sand.u32 (!%p199_p3), 1, %s744_s10  }
  0x33   : > { %202 = sbr.rel (%p199_p3) target bundleno = 629 (0x275), region = 62  ;;  %s505_s25 = sshll.u32 (!%p199_p3), %s227_s26, 4 }
  0x34   : > { %s546_s27 = smul.u32 (!%p199_p3), 40, %s205_s29  ;;  %p230_p4 = scmp.lt.s32.totalorder (!%p199_p3), %s768_s16, 1 }
  0x35   : > { %s933_s0 = scalar_lea.vmem (!%p199_p3), [#allocation5], %s505_s25  ;;  %p507_p5 = scmp.ne.s32.totalorder (!%p199_p3), %s760_s14, 0 }
  0x36   : > { %s207_s28 = scalar_lea.vmem (!%p199_p3), [#allocation4], %s546_s27 }
  0x3a   : > { %s231_s30 = scalar_select %p230_p4, %s768_s16, 1 }
  0x3b   : > { %237 = sbr.rel (%p507_p5) target bundleno = 66 (0x42), region = 70  ;;  %vm238_vm0 = vcmask (!%p507_p5), 7168   ;;  %v786_v5 = vmov (!%p507_p5), 0.0  }
  0x3c   : > { %s506_s22 = sshll.u32 %s231_s30, 3  ;;  %239 = vst.msk [vmem:[#allocation2] sm:$0xff] (!%p507_p5), %vm238_vm0, %v786_v5  ;;  %240 = vst.msk [vmem:[#allocation3] sm:$0xff] (!%p507_p5), %vm238_vm0, %v786_v5 }
  0x3d   : > { %s233_s7 = scalar_lea.vmem %s1010_s1, %s506_s22 }
  0x42 PF: > { %v242_v6 = vld [vmem:[%s207_s28] sm:$0xff]  ;;  %v243_v7 = vld [vmem:[%s207_s28 + $0x8] sm:$0xff]  ;;  %v244_v8 = vld [vmem:[%s207_s28 + $0x10] sm:$0xff]  ;;  %v787_v9 = vmov 0.0|0.0   ;;  %vm788_vm1 = vmmov 0   ;;  %v789_v12 = vmov 0.0  }
  0x43   : > { %538 = vmatprep.subr.bf16.mxu0 %v787_v9  ;;  %v539_v10 = vpack.c.bf16 %v243_v7, %v242_v6  ;;  %v245_v11 = vld [vmem:[%s207_s28 + $0x18] sm:$0xff]  ;;  %535 = vmatprep.mubr.msk.f32.mxu0 %vm788_vm1, %v789_v12  ;;  %v246_v14 = vld [vmem:[%s207_s28 + $0x20] sm:$0xf]  ;;  %vm251_vm2 = vcmask 1043456   ;;  %v241_v15 = vld [vmem:[%s233_s7] sm:$0xff]  ;;  %vm247_vm3 = vcmask 293888  }
  0x44   : > { %v542_v13 = vpack.c.bf16 %v245_v11, %v244_v8  ;;  %s510_s12 = sshll.u32 %s760_s14, 7  ;;  %v325_v19 = vld [vmem:[#allocation2] sm:$0xff]  ;;  %vm329_vm4 = vcmask 7168   ;;  %v331_v22 = vld [vmem:[#allocation3] sm:$0xff]  ;;  %p512_p6 = scmp.ne.s32.totalorder %s760_s14, 1 }
  0x45   : > { %540 = vmatpush3.bf16.msra.mxu0 %v539_v10  ;;  %s338_s29 = sshra.s32 %s510_s12, 7  ;;  %v790_v27 = vmov (!%p512_p6), 0  }
  0x46   : > { %541 = vmatprep.subr.bf16.mxu0 %v787_v9  ;;  %s511_s27 = sshll.u32 %s338_s29, 3  ;;  %655 = vset.pattern.permute.xlu0 (!%p512_p6), %v790_v27 }
  0x47   : > { %s341_s25 = scalar_lea.vmem %s933_s0, %s511_s27 [#allocation5] }
  0x49   : > { %543 = vmatpush3.bf16.msra.mxu0 %v542_v13 }
  0x4a   : > { %533 = vmatprep.subr.mxu0 %v789_v12 }
  0x4d   : > { %534 = vmatpush3.msk.msra.mxu0 %vm251_vm2, %v246_v14 }
  0x4e   : > { %536 = vmatmul.mubr.msk.f32.vlgmr.msra.gmra.mrb[0].mxu0 %vm247_vm3, %v241_v15 }
 0x121   : > { %v321_v16 = vpop.f32.mrb[0].mxu0 }
 0x122   : > { %342 = vst [vmem:[%s341_s25] sm:$0xff] %v321_v16  ;;  %326 = vadd.xlane.f32.xlu0 %v321_v16  ;;  %v537_v17 = vpop.f32.mrb[1].mxu0  ;;  %v332_v18 = vmul.f32 %v321_v16, %v321_v16 }
 0x126   : > { %333 = vadd.xlane.f32.xlu0 %v332_v18 }
 0x129   : > { %v357_v36 = vld [vmem:[%s933_s0] sm:$0xff] (!%p512_p6)  ;;  %v374_v37 = vld [vmem:[%s933_s0 + $0x8] sm:$0xff] (!%p512_p6) }
 0x1af   : > { %v327_v20 = vpop.xlane.xlu0 %326 }
 0x1b0   : > { %v328_v21 = vadd.f32 %v327_v20, %v325_v19  ;;  %346 = sbr.rel (%p512_p6) target bundleno = 603 (0x25b), region = 74 }
 0x1b2   : > { %330 = vst.msk [vmem:[#allocation2] sm:$0xff] %vm329_vm4, %v328_v21 }
 0x1b3   : > { %v334_v23 = vpop.xlane.xlu0 %333 }
 0x1b4   : > { %v335_v24 = vadd.f32 %v334_v23, %v331_v22 }
 0x1b6   : > { %336 = vst.msk [vmem:[#allocation3] sm:$0xff] %vm329_vm4, %v335_v24 }
 0x1b9   : > { %v347_v25 = vld [vmem:[#allocation2] sm:$0xff] }
 0x1ba   : > { %v348_v28 = vmul.f32 0.00390625, %v347_v25 }
 0x1bc   : > { %v351_v30 = vmul.f32 %v348_v28, %v348_v28 }
 0x1bd   : > { %v349_v26 = vld [vmem:[#allocation3] sm:$0xff] }
 0x1be   : > { %v350_v29 = vmul.f32 0.00390625, %v349_v26 }
 0x1c0   : > { %v352_v31 = vsub.f32 %v350_v29, %v351_v30 }
 0x1c2   : > { %v353_v32 = vmax.f32 %v352_v31, 0.0 }
 0x1c4   : > { %v354_v33 = vadd.f32 1e-05, %v353_v32 }
 0x1c6   : > { %656 = vrsqrt.f32 %v354_v33 }
 0x1d0   : > { %v657_v34 = vpop.eup %656 }
 0x1d1   : > { %360 = vperm.xlu0 %655, %v657_v34   ;;  %v356_v35 = vmul.f32 %v657_v34, %v348_v28 }
 0x1d5   : > { %366 = vperm.xlu0 %655, %v356_v35  }
 0x250   : > { %v361_v38 = vpop.permute.xlu0 %360 }
 0x251   : > { %v363_v39 = vmul.f32 %v361_v38, %v357_v36  ;;  %v375_v40 = vmul.f32 %v374_v37, %v361_v38 }
 0x254   : > { %v367_v41 = vpop.permute.xlu0 %366 }
 0x255   : > { %v369_v42 = vsub.f32 %v363_v39, %v367_v41  ;;  %v376_v43 = vsub.f32 %v375_v40, %v367_v41 }
 0x257   : > { %vm370_vm5 = vcmp.gt.f32.partialorder %v369_v42, 0.0  ;;  %v371_v44 = vmul.f32 0.2, %v369_v42  ;;  %vm377_vm6 = vcmp.gt.f32.partialorder %v376_v43, 0.0  ;;  %v378_v45 = vmul.f32 0.2, %v376_v43 }
 0x259   : > { %v372_v46 = vsel %vm370_vm5, %v369_v42, %v371_v44  ;;  %v379_v47 = vsel %vm377_vm6, %v376_v43, %v378_v45 }
 0x25a   : > { %373 = vst [vmem:[%s933_s0] sm:$0xff] %v372_v46  ;;  %380 = vst [vmem:[%s933_s0 + $0x8] sm:$0xff] %v379_v47 }
 0x25b PF: > { %s514_s14 = sshll.u32 %s768_s16, 1  ;;  %s515_s30 = sshll.u32 %s764_s15, 2 }
 0x25c   : > { %s398_s22 = sshll.u32 %s933_s0, 4  ;;  %s394_s3 = sadd.s32 %s515_s30, %s514_s14  ;;  %s946_s22 = int_to_ptr.vmem [resolvable:$true] %s398_s22 }
 0x25d   : > { %s516_s6 = sshll.u32 %s394_s3, 7  ;;  %s382_s29 = scalar_lea.sflag [#allocation6], %s227_s26 }
 0x25e   : > { %s396_s12 = scalar_lea.hbm %s1011_s2, %s516_s6  ;;  %s658_s27 = scalar_lea.vmem %s946_s22, 256 }
 0x25f   : > { %p659_p7 = scmp.ne.s32.totalorder %s946_s22, %s658_s27  ;;  %s791_s15 = smov [#allocation5]  }
 0x260   : > { %s662_s0 = sshll.u32 %s791_s15, 4  ;;  %s663_s0 = int_to_ptr.vmem [resolvable:$false] %s662_s0 }
 0x261   : > { %p660_p8 = pnand %p659_p7, %p893_p9  ;;  %s664_s16 = scalar_lea.vmem %s663_s0, 512 }
 0x262   : > { %p665_p11 = scmp.lt.s32.totalorder %s946_s22, %s663_s0  ;;  %p666_p12 = scmp.lt.s32.totalorder %s664_s16, %s658_s27 }
 0x263   : > { %p661_p10 = pneg %p660_p8 }
 0x264   : > { %p667_p0 = por %p666_p12, %p665_p11 }
 0x266   : > { %p668_p1 = pnand %p667_p0, %p661_p10 }
 0x268   : > { %671 = shalt.err (!%p668_p1)
}
 0x269   : > { %s672_s25 = scalar_lea.hbm %s396_s12, 256  ;;  %s676_s30 = scalar_lea.hbm %s1011_s2, 1024 }
 0x26a   : > { %p673_p2 = scmp.ne.s32.totalorder %s396_s12, %s672_s25  ;;  %p677_p5 = scmp.lt.u32.totalorder %s396_s12, %s1011_s2 }
 0x26b   : > { %p678_p6 = scmp.lt.u32.totalorder %s676_s30, %s672_s25  ;;  %p680_p8 = scmp.lt.u32.totalorder %s672_s25, %s396_s12 }
 0x26c   : > { %p674_p3 = pnand %p673_p2, %p893_p9 }
 0x26d   : > { %p679_p7 = por %p678_p6, %p677_p5 }
 0x26e   : > { %p675_p4 = pneg %p674_p3 }
 0x26f   : > { %p681_p11 = por %p680_p8, %p679_p7 }
 0x271   : > { %p682_p10 = pnand %p681_p11, %p675_p4 }
 0x273   : > { %685 = shalt.err (!%p682_p10)
}
 0x274   : > { %547 = dma.vmem_to_hbm [thread:$0]  (%p893_p9), %s946_s22, 256, %s396_s12, %s382_s29  }
 0x275 PF: > { %p553_p12 = scmp.ge.s32.totalorder %s784_s20, 2  ;;  %s410_s7 = sand.u32 1, %s740_s9  }
 0x276   : > { %s411_s28 = scalar_lea.sflag [#allocation6], %s410_s7 }
 0x277   : > { %p550_p0 = pnand %p553_p12, %p906_p13 }
 0x279   : > { %735 = dma.done.wait (!%p550_p0), %s411_s28, 256  }
 0x27a   : > { %737 = vsyncadd (!%p550_p0), %s411_s28, 4294967040  ;;  %s15_s20 = sadd.s32 1, %s784_s20   ;;  %s1019_s4 = sld [smem:[#allocation8_spill]] }
 0x27b   : > { %p12_p1 = scmp.ge.s32.totalorder %s15_s20, 10   ;;  %s1020_s9 = smov %s744_s10 }
 0x27c   : > { %s1021_s10 = smov %s748_s11  ;;  %s1022_s11 = smov %s911_s21 }
 0x27d   : > { %s1023_s12 = smov %s756_s13  ;;  %s1024_s13 = smov %s900_s5 }
 0x27e   : > { %s1025_s14 = smov %s772_s17  ;;  %s1026_s15 = smov %s776_s18 }
 0x27f   : > { %s1027_s16 = smov %s780_s19  ;;  %s1028_s17 = smov %s1032_s23 }
 0x280   : > { %s1029_s18 = smov %s1036_s24  ;;  %s1030_s19 = smov %s1019_s4 }
 0x281   :  { %14 = sbr.rel (!%p12_p1) target bundleno = 9 (0x9), region = 118 }
 0x288   :  { %416 = vsyncpa [#allocation6], 1 }
 0x289   :  { %418 = vsyncpa [#allocation6 + $0x1], 1 }

</bundles_post_ra>
